<compile_context>
chip_gen: v5e
topology: v5e:2x2
jax: 0.10.0
libtpu: 0.0.40
codegen_flags: <defaults>
</compile_context>

<pallas_src>
import functools

import jax
import jax.numpy as jnp
from jax.experimental import pallas as pl
from jax.experimental.pallas import tpu as pltpu


# Activation schedule of the Line module (7 layers).
ACTS = ("tanh", "tanh", "relu", "relu", "tanh", "tanh", None)


def make_line_kernel(out_features, inv_n, tb, batch, needs_mask):
    """Build the kernel; all captured values are Python compile-time constants."""

    def line_kernel(x_ref, y_ref, w1_ref, w_ref, b_ref, ypre_ref, loss_ref):
        i = pl.program_id(0)

        @pl.when(i == 0)
        def _init():
            loss_ref[0, 0] = 0.0

        # ---- Layer 1: (P, in) @ (in, TB) -> (P, TB); batch lives in the lane axis.
        h = jnp.dot(w1_ref[...], x_ref[...], preferred_element_type=jnp.float32)
        h = h + b_ref[0]                          # (P, 1) broadcast along lanes
        h = jnp.tanh(h)

        # ---- Layers 2..7 (weights resident across the whole grid).
        for idx, act in enumerate(ACTS[1:]):
            z = jnp.dot(w_ref[idx], h, preferred_element_type=jnp.float32)
            z = z + b_ref[idx + 1]
            if act == "tanh":
                z = jnp.tanh(z)                   # EUP
            elif act == "relu":
                z = jnp.maximum(z, 0.0)           # VPU
            h = z

        y_pre = h[:out_features, :]               # (out, TB), lane-dense
        ypre_ref[...] = y_pre

        # ---- MSE partial for this batch tile, accumulated into one SMEM scalar.
        d = y_pre - y_ref[...]
        if needs_mask:
            lane = jax.lax.broadcasted_iota(jnp.int32, d.shape, 1)
            d = jnp.where(i * tb + lane < batch, d, 0.0)
        loss_ref[0, 0] += jnp.sum(d * d)

        @pl.when(i == pl.num_programs(0) - 1)
        def _finalize():
            loss_ref[0, 0] = loss_ref[0, 0] * inv_n   # MSE 'mean' reduction

    return line_kernel


def pack_params(params):
    """One-time packing of [(W(out,in), b(out,)), ...] (PyTorch layout) into slabs.

    Returns w1 (P, in), w_rest (n-1, P, P), b_all (n, P, 1); padded rows/cols are
    zero so padded activation rows stay exactly 0 (tanh(0)=0, relu(0)=0).
    """
    n = len(params)
    in_features = params[0][0].shape[1]
    widths = [w.shape[0] for w, _ in params]
    p = max(widths + [w.shape[1] for w, _ in params[1:]])
    p = ((p + 7) // 8) * 8                       # sublane-aligned uniform width

    w1 = jnp.zeros((p, in_features), jnp.float32).at[: widths[0], :].set(params[0][0])
    w_rest = jnp.zeros((n - 1, p, p), jnp.float32)
    for i, (w, _) in enumerate(params[1:]):
        w_rest = w_rest.at[i, : w.shape[0], : w.shape[1]].set(w)
    b_all = jnp.zeros((n, p, 1), jnp.float32)
    for i, (_, b) in enumerate(params):
        b_all = b_all.at[i, : b.shape[0], 0].set(b)

    return dict(w1=w1, w_rest=w_rest, b_all=b_all, p=p,
                in_features=in_features, out_features=widths[-1], n_layers=n)


def line_forward(x, y, packed, *, tile_batch=256):
    """x: (batch, in_features) f32, y: (batch, out_features) f32 -> (y_pre, loss)."""
    batch, in_f = x.shape
    out_f = packed["out_features"]
    p = packed["p"]
    n_layers = packed["n_layers"]

    if batch <= tile_batch:
        tb, pad_batch = batch, batch             # single grid step (v5e/v6e friendly)
    else:
        tb = max(128, (tile_batch // 128) * 128)  # lane-dim tile must be 128-aligned
        pad_batch = pl.cdiv(batch, tb) * tb       # pad batch instead of tb=batch fallback
    num_tiles = pad_batch // tb
    needs_mask = pad_batch != batch

    # Hot-path wrapper ops: just two tiny transposes (batch -> lane axis).
    x_t = x.T                                    # (in, B)
    y_t = y.T                                    # (out, B)
    if needs_mask:
        x_t = jnp.pad(x_t, ((0, 0), (0, pad_batch - batch)))
        y_t = jnp.pad(y_t, ((0, 0), (0, pad_batch - batch)))

    inv_n = 1.0 / float(batch * out_f)
    kernel = make_line_kernel(out_f, inv_n, tb, batch, needs_mask)

    y_pre_t, loss_arr = pl.pallas_call(
        kernel,
        out_shape=(
            jax.ShapeDtypeStruct((out_f, pad_batch), jnp.float32),   # y_pre, transposed
            jax.ShapeDtypeStruct((1, 1), jnp.float32),               # accumulated SSE
        ),
        grid=(num_tiles,),
        in_specs=[
            pl.BlockSpec((in_f, tb), lambda i: (0, i)),              # x batch tile
            pl.BlockSpec((out_f, tb), lambda i: (0, i)),             # y batch tile
            pl.BlockSpec((p, in_f), lambda i: (0, 0)),               # w1 (resident)
            pl.BlockSpec((n_layers - 1, p, p), lambda i: (0, 0, 0)),  # w2..w7 (resident)
            pl.BlockSpec((n_layers, p, 1), lambda i: (0, 0, 0)),      # biases (resident)
        ],
        out_specs=(
            pl.BlockSpec((out_f, tb), lambda i: (0, i)),             # lane-dense store
            pl.BlockSpec((1, 1), lambda i: (0, 0), memory_space=pltpu.SMEM),
        ),
        compiler_params=pltpu.CompilerParams(
            dimension_semantics=("arbitrary",)),                     # loss resident across grid
    )(x_t, y_t, packed["w1"], packed["w_rest"], packed["b_all"])

    y_pre = (y_pre_t[:, :batch] if needs_mask else y_pre_t).T
    return y_pre, loss_arr[0, 0]


def init_params(key, dims):
    """PyTorch nn.Linear-style init; W stored in PyTorch (out, in) layout."""
    params = []
    for i in range(len(dims) - 1):
        fan_in, fan_out = dims[i], dims[i + 1]
        key, kw, kb = jax.random.split(key, 3)
        bound = float(fan_in) ** -0.5
        w = jax.random.uniform(kw, (fan_out, fan_in), jnp.float32, -bound, bound)
        b = jax.random.uniform(kb, (fan_out,), jnp.float32, -bound, bound)
        params.append((w, b))
    return params


if __name__ == "__main__":
    # Module hyper-params (from config.model_params)
    in_features = 16
    first_output = 32
    hidden_size = 32
    last_output = 32
    out_features = 8
    batch = 256            # 2 x 128 lanes; fits a single grid step

    key = jax.random.PRNGKey(0)
    key, kx, ky = jax.random.split(key, 3)
    x = jax.random.normal(kx, (batch, in_features), jnp.float32)
    y = jax.random.normal(ky, (batch, out_features), jnp.float32)

    dims = [in_features, first_output, hidden_size, hidden_size,
            hidden_size, hidden_size, last_output, out_features]
    params = init_params(key, dims)
    packed = pack_params(params)               # one-time packing, outside the hot path

    fwd = jax.jit(functools.partial(line_forward, packed=packed))
    y_pre, loss = fwd(x, y)
    jax.block_until_ready((y_pre, loss))

    # Pure-JAX f32 reference (tolerance covers MXU/XLA default matmul precision).
    h = x
    acts = [jnp.tanh, jnp.tanh, jax.nn.relu, jax.nn.relu, jnp.tanh, jnp.tanh, None]
    for (w, b), act in zip(params, acts):
        h = h @ w.T + b
        if act is not None:
            h = act(h)
    ref_loss = jnp.mean((h - y) ** 2)

    assert y_pre.shape == (batch, out_features)
    assert jnp.allclose(y_pre, h, atol=2e-2, rtol=2e-2), float(jnp.max(jnp.abs(y_pre - h)))
    assert jnp.allclose(loss, ref_loss, atol=1e-2, rtol=1e-2), (float(loss), float(ref_loss))

    print("KERNEL_OK")
</pallas_src>

<mosaic_0001>
module attributes {stable_mosaic.version = 11 : i64} {
  func.func @line_kernel(%arg0: i32, %arg1: memref<16x256xf32, #tpu.memory_space<vmem>>, %arg2: memref<8x256xf32, #tpu.memory_space<vmem>>, %arg3: memref<32x16xf32, #tpu.memory_space<vmem>>, %arg4: memref<6x32x32xf32, #tpu.memory_space<vmem>>, %arg5: memref<7x32x1xf32, #tpu.memory_space<vmem>>, %arg6: memref<8x256xf32, #tpu.memory_space<vmem>>, %arg7: memref<1x1xf32, #tpu.memory_space<smem>>) attributes {dimension_semantics = [#tpu.dimension_semantics<arbitrary>], iteration_bounds = array<i64: 1>, scalar_prefetch = 0 : i64, scratch_operands = 0 : i64, tpu.core_type = #tpu.core_type<tc>, window_params = [{transform_indices = @transform_0, window_bounds = array<i64: 16, 256>}, {transform_indices = @transform_1, window_bounds = array<i64: 8, 256>}, {pipeline_mode = #tpu.pipeline_mode<synchronous>, transform_indices = @transform_2, window_bounds = array<i64: 32, 16>}, {pipeline_mode = #tpu.pipeline_mode<synchronous>, transform_indices = @transform_3, window_bounds = array<i64: 6, 32, 32>}, {pipeline_mode = #tpu.pipeline_mode<synchronous>, transform_indices = @transform_4, window_bounds = array<i64: 7, 32, 1>}, {transform_indices = @transform_5, window_bounds = array<i64: 8, 256>}, {transform_indices = @transform_6, window_bounds = array<i64: 1, 1>}]} {
    %c0_i32 = arith.constant 0 : i32
    %0 = arith.cmpi eq, %arg0, %c0_i32 : i32
    %1 = arith.extui %0 : i1 to i32
    %c0_i32_0 = arith.constant 0 : i32
    %2 = arith.cmpi ne, %1, %c0_i32_0 : i32
    scf.if %2 {
      %cst_56 = arith.constant 0.000000e+00 : f32
      %c0_57 = arith.constant 0 : index
      %c0_58 = arith.constant 0 : index
      %75 = memref.load %arg7[%c0_57, %c0_58] : memref<1x1xf32, #tpu.memory_space<smem>>
      memref.store %cst_56, %arg7[%c0_57, %c0_58] : memref<1x1xf32, #tpu.memory_space<smem>>
    } else {
    }
    %c0 = arith.constant 0 : index
    %c0_1 = arith.constant 0 : index
    %3 = vector.load %arg3[%c0, %c0_1] : memref<32x16xf32, #tpu.memory_space<vmem>>, vector<32x16xf32>
    %c0_2 = arith.constant 0 : index
    %c0_3 = arith.constant 0 : index
    %4 = vector.load %arg1[%c0_2, %c0_3] : memref<16x256xf32, #tpu.memory_space<vmem>>, vector<16x256xf32>
    %cst = arith.constant dense<0.000000e+00> : vector<32x256xf32>
    %5 = tpu.matmul %3, %4, %cst {dimension_numbers = #tpu.dot_dimension_numbers<[1], [0], [0], [1], [0, 0, 1, 1], [], []>} : vector<32x16xf32>, vector<16x256xf32>, vector<32x256xf32> -> vector<32x256xf32>
    %c0_4 = arith.constant 0 : index
    %c0_5 = arith.constant 0 : index
    %c0_6 = arith.constant 0 : index
    %6 = vector.load %arg5[%c0_4, %c0_5, %c0_6] : memref<7x32x1xf32, #tpu.memory_space<vmem>>, vector<1x32x1xf32>
    %7 = vector.shape_cast %6 : vector<1x32x1xf32> to vector<32x1xf32>
    %8 = vector.broadcast %7 : vector<32x1xf32> to vector<32x256xf32>
    %9 = arith.addf %5, %8 : vector<32x256xf32>
    %10 = math.tanh %9 : vector<32x256xf32>
    %c0_7 = arith.constant 0 : index
    %c0_8 = arith.constant 0 : index
    %c0_9 = arith.constant 0 : index
    %11 = vector.load %arg4[%c0_7, %c0_8, %c0_9] : memref<6x32x32xf32, #tpu.memory_space<vmem>>, vector<1x32x32xf32>
    %12 = vector.shape_cast %11 : vector<1x32x32xf32> to vector<32x32xf32>
    %cst_10 = arith.constant dense<0.000000e+00> : vector<32x256xf32>
    %13 = tpu.matmul %12, %10, %cst_10 {dimension_numbers = #tpu.dot_dimension_numbers<[1], [0], [0], [1], [0, 0, 1, 1], [], []>} : vector<32x32xf32>, vector<32x256xf32>, vector<32x256xf32> -> vector<32x256xf32>
    %c1 = arith.constant 1 : index
    %c0_11 = arith.constant 0 : index
    %c0_12 = arith.constant 0 : index
    %14 = vector.load %arg5[%c1, %c0_11, %c0_12] : memref<7x32x1xf32, #tpu.memory_space<vmem>>, vector<1x32x1xf32>
    %15 = vector.shape_cast %14 : vector<1x32x1xf32> to vector<32x1xf32>
    %16 = vector.broadcast %15 : vector<32x1xf32> to vector<32x256xf32>
    %17 = arith.addf %13, %16 : vector<32x256xf32>
    %18 = math.tanh %17 : vector<32x256xf32>
    %c1_13 = arith.constant 1 : index
    %c0_14 = arith.constant 0 : index
    %c0_15 = arith.constant 0 : index
    %19 = vector.load %arg4[%c1_13, %c0_14, %c0_15] : memref<6x32x32xf32, #tpu.memory_space<vmem>>, vector<1x32x32xf32>
    %20 = vector.shape_cast %19 : vector<1x32x32xf32> to vector<32x32xf32>
    %cst_16 = arith.constant dense<0.000000e+00> : vector<32x256xf32>
    %21 = tpu.matmul %20, %18, %cst_16 {dimension_numbers = #tpu.dot_dimension_numbers<[1], [0], [0], [1], [0, 0, 1, 1], [], []>} : vector<32x32xf32>, vector<32x256xf32>, vector<32x256xf32> -> vector<32x256xf32>
    %c2 = arith.constant 2 : index
    %c0_17 = arith.constant 0 : index
    %c0_18 = arith.constant 0 : index
    %22 = vector.load %arg5[%c2, %c0_17, %c0_18] : memref<7x32x1xf32, #tpu.memory_space<vmem>>, vector<1x32x1xf32>
    %23 = vector.shape_cast %22 : vector<1x32x1xf32> to vector<32x1xf32>
    %24 = vector.broadcast %23 : vector<32x1xf32> to vector<32x256xf32>
    %25 = arith.addf %21, %24 : vector<32x256xf32>
    %cst_19 = arith.constant 0.000000e+00 : f32
    %26 = vector.broadcast %cst_19 : f32 to vector<32x256xf32>
    %27 = arith.maximumf %25, %26 : vector<32x256xf32>
    %c2_20 = arith.constant 2 : index
    %c0_21 = arith.constant 0 : index
    %c0_22 = arith.constant 0 : index
    %28 = vector.load %arg4[%c2_20, %c0_21, %c0_22] : memref<6x32x32xf32, #tpu.memory_space<vmem>>, vector<1x32x32xf32>
    %29 = vector.shape_cast %28 : vector<1x32x32xf32> to vector<32x32xf32>
    %cst_23 = arith.constant dense<0.000000e+00> : vector<32x256xf32>
    %30 = tpu.matmul %29, %27, %cst_23 {dimension_numbers = #tpu.dot_dimension_numbers<[1], [0], [0], [1], [0, 0, 1, 1], [], []>} : vector<32x32xf32>, vector<32x256xf32>, vector<32x256xf32> -> vector<32x256xf32>
    %c3 = arith.constant 3 : index
    %c0_24 = arith.constant 0 : index
    %c0_25 = arith.constant 0 : index
    %31 = vector.load %arg5[%c3, %c0_24, %c0_25] : memref<7x32x1xf32, #tpu.memory_space<vmem>>, vector<1x32x1xf32>
    %32 = vector.shape_cast %31 : vector<1x32x1xf32> to vector<32x1xf32>
    %33 = vector.broadcast %32 : vector<32x1xf32> to vector<32x256xf32>
    %34 = arith.addf %30, %33 : vector<32x256xf32>
    %cst_26 = arith.constant 0.000000e+00 : f32
    %35 = vector.broadcast %cst_26 : f32 to vector<32x256xf32>
    %36 = arith.maximumf %34, %35 : vector<32x256xf32>
    %c3_27 = arith.constant 3 : index
    %c0_28 = arith.constant 0 : index
    %c0_29 = arith.constant 0 : index
    %37 = vector.load %arg4[%c3_27, %c0_28, %c0_29] : memref<6x32x32xf32, #tpu.memory_space<vmem>>, vector<1x32x32xf32>
    %38 = vector.shape_cast %37 : vector<1x32x32xf32> to vector<32x32xf32>
    %cst_30 = arith.constant dense<0.000000e+00> : vector<32x256xf32>
    %39 = tpu.matmul %38, %36, %cst_30 {dimension_numbers = #tpu.dot_dimension_numbers<[1], [0], [0], [1], [0, 0, 1, 1], [], []>} : vector<32x32xf32>, vector<32x256xf32>, vector<32x256xf32> -> vector<32x256xf32>
    %c4 = arith.constant 4 : index
    %c0_31 = arith.constant 0 : index
    %c0_32 = arith.constant 0 : index
    %40 = vector.load %arg5[%c4, %c0_31, %c0_32] : memref<7x32x1xf32, #tpu.memory_space<vmem>>, vector<1x32x1xf32>
    %41 = vector.shape_cast %40 : vector<1x32x1xf32> to vector<32x1xf32>
    %42 = vector.broadcast %41 : vector<32x1xf32> to vector<32x256xf32>
    %43 = arith.addf %39, %42 : vector<32x256xf32>
    %44 = math.tanh %43 : vector<32x256xf32>
    %c4_33 = arith.constant 4 : index
    %c0_34 = arith.constant 0 : index
    %c0_35 = arith.constant 0 : index
    %45 = vector.load %arg4[%c4_33, %c0_34, %c0_35] : memref<6x32x32xf32, #tpu.memory_space<vmem>>, vector<1x32x32xf32>
    %46 = vector.shape_cast %45 : vector<1x32x32xf32> to vector<32x32xf32>
    %cst_36 = arith.constant dense<0.000000e+00> : vector<32x256xf32>
    %47 = tpu.matmul %46, %44, %cst_36 {dimension_numbers = #tpu.dot_dimension_numbers<[1], [0], [0], [1], [0, 0, 1, 1], [], []>} : vector<32x32xf32>, vector<32x256xf32>, vector<32x256xf32> -> vector<32x256xf32>
    %c5 = arith.constant 5 : index
    %c0_37 = arith.constant 0 : index
    %c0_38 = arith.constant 0 : index
    %48 = vector.load %arg5[%c5, %c0_37, %c0_38] : memref<7x32x1xf32, #tpu.memory_space<vmem>>, vector<1x32x1xf32>
    %49 = vector.shape_cast %48 : vector<1x32x1xf32> to vector<32x1xf32>
    %50 = vector.broadcast %49 : vector<32x1xf32> to vector<32x256xf32>
    %51 = arith.addf %47, %50 : vector<32x256xf32>
    %52 = math.tanh %51 : vector<32x256xf32>
    %c5_39 = arith.constant 5 : index
    %c0_40 = arith.constant 0 : index
    %c0_41 = arith.constant 0 : index
    %53 = vector.load %arg4[%c5_39, %c0_40, %c0_41] : memref<6x32x32xf32, #tpu.memory_space<vmem>>, vector<1x32x32xf32>
    %54 = vector.shape_cast %53 : vector<1x32x32xf32> to vector<32x32xf32>
    %cst_42 = arith.constant dense<0.000000e+00> : vector<32x256xf32>
    %55 = tpu.matmul %54, %52, %cst_42 {dimension_numbers = #tpu.dot_dimension_numbers<[1], [0], [0], [1], [0, 0, 1, 1], [], []>} : vector<32x32xf32>, vector<32x256xf32>, vector<32x256xf32> -> vector<32x256xf32>
    %c6 = arith.constant 6 : index
    %c0_43 = arith.constant 0 : index
    %c0_44 = arith.constant 0 : index
    %56 = vector.load %arg5[%c6, %c0_43, %c0_44] : memref<7x32x1xf32, #tpu.memory_space<vmem>>, vector<1x32x1xf32>
    %57 = vector.shape_cast %56 : vector<1x32x1xf32> to vector<32x1xf32>
    %58 = vector.broadcast %57 : vector<32x1xf32> to vector<32x256xf32>
    %59 = arith.addf %55, %58 : vector<32x256xf32>
    %60 = vector.extract_strided_slice %59 {offsets = [0, 0], sizes = [8, 256], strides = [1, 1]} : vector<32x256xf32> to vector<8x256xf32>
    %c0_45 = arith.constant 0 : index
    %c0_46 = arith.constant 0 : index
    %61 = vector.load %arg6[%c0_45, %c0_46] : memref<8x256xf32, #tpu.memory_space<vmem>>, vector<8x256xf32>
    tpu.vector_store %arg6[%c0_45, %c0_46], %60 {strides = array<i32>} : memref<8x256xf32, #tpu.memory_space<vmem>>, vector<8x256xf32>,
    %c0_47 = arith.constant 0 : index
    %c0_48 = arith.constant 0 : index
    %62 = vector.load %arg2[%c0_47, %c0_48] : memref<8x256xf32, #tpu.memory_space<vmem>>, vector<8x256xf32>
    %63 = arith.subf %60, %62 : vector<8x256xf32>
    %c0_49 = arith.constant 0 : index
    %c0_50 = arith.constant 0 : index
    %64 = memref.load %arg7[%c0_49, %c0_50] : memref<1x1xf32, #tpu.memory_space<smem>>
    %65 = arith.mulf %63, %63 : vector<8x256xf32>
    %66 = vector.shape_cast %65 : vector<8x256xf32> to vector<1x8x256xf32>
    %cst_51 = arith.constant dense<0.000000e+00> : vector<1xf32>
    %67 = vector.multi_reduction <add>, %66, %cst_51 [1, 2] : vector<1x8x256xf32> to vector<1xf32>
    %68 = vector.shape_cast %67 : vector<1xf32> to vector<1x1x1xf32>
    %69 = vector.extract %68[0, 0, 0] : f32 from vector<1x1x1xf32>
    %70 = arith.addf %64, %69 : f32
    %c0_52 = arith.constant 0 : index
    %c0_53 = arith.constant 0 : index
    %71 = memref.load %arg7[%c0_52, %c0_53] : memref<1x1xf32, #tpu.memory_space<smem>>
    memref.store %70, %arg7[%c0_52, %c0_53] : memref<1x1xf32, #tpu.memory_space<smem>>
    %c0_i32_54 = arith.constant 0 : i32
    %72 = arith.cmpi eq, %arg0, %c0_i32_54 : i32
    %73 = arith.extui %72 : i1 to i32
    %c0_i32_55 = arith.constant 0 : i32
    %74 = arith.cmpi ne, %73, %c0_i32_55 : i32
    scf.if %74 {
      %c0_56 = arith.constant 0 : index
      %c0_57 = arith.constant 0 : index
      %75 = memref.load %arg7[%c0_56, %c0_57] : memref<1x1xf32, #tpu.memory_space<smem>>
      %cst_58 = arith.constant 4.8828125E-4 : f32
      %76 = arith.mulf %75, %cst_58 : f32
      %c0_59 = arith.constant 0 : index
      %c0_60 = arith.constant 0 : index
      %77 = memref.load %arg7[%c0_59, %c0_60] : memref<1x1xf32, #tpu.memory_space<smem>>
      memref.store %76, %arg7[%c0_59, %c0_60] : memref<1x1xf32, #tpu.memory_space<smem>>
    } else {
    }
    return
  }
  func.func @transform_0(%arg0: i32) -> (i32, i32) {
    %c0_i32 = arith.constant 0 : i32
    %c0_i32_0 = arith.constant 0 : i32
    return %c0_i32, %arg0 : i32, i32
  }
  func.func @transform_1(%arg0: i32) -> (i32, i32) {
    %c0_i32 = arith.constant 0 : i32
    %c0_i32_0 = arith.constant 0 : i32
    return %c0_i32, %arg0 : i32, i32
  }
  func.func @transform_2(%arg0: i32) -> (i32, i32) {
    %c0_i32 = arith.constant 0 : i32
    %c0_i32_0 = arith.constant 0 : i32
    %c0_i32_1 = arith.constant 0 : i32
    return %c0_i32, %c0_i32_0 : i32, i32
  }
  func.func @transform_3(%arg0: i32) -> (i32, i32, i32) {
    %c0_i32 = arith.constant 0 : i32
    %c0_i32_0 = arith.constant 0 : i32
    %c0_i32_1 = arith.constant 0 : i32
    %c0_i32_2 = arith.constant 0 : i32
    return %c0_i32, %c0_i32_0, %c0_i32_1 : i32, i32, i32
  }
  func.func @transform_4(%arg0: i32) -> (i32, i32, i32) {
    %c0_i32 = arith.constant 0 : i32
    %c0_i32_0 = arith.constant 0 : i32
    %c0_i32_1 = arith.constant 0 : i32
    %c0_i32_2 = arith.constant 0 : i32
    return %c0_i32, %c0_i32_0, %c0_i32_1 : i32, i32, i32
  }
  func.func @transform_5(%arg0: i32) -> (i32, i32) {
    %c0_i32 = arith.constant 0 : i32
    %c0_i32_0 = arith.constant 0 : i32
    return %c0_i32, %arg0 : i32, i32
  }
  func.func @transform_6(%arg0: i32) -> (i32, i32) {
    %c0_i32 = arith.constant 0 : i32
    %c0_i32_0 = arith.constant 0 : i32
    %c0_i32_1 = arith.constant 0 : i32
    return %c0_i32, %c0_i32_0 : i32, i32
  }
}

</mosaic_0001>

<bundles_post_ra>
// kernel: line_forward.1
= control target key start
LH: loop header
LB: loop body
LE: loop exit
PB: predicated region body
PF: predicated region fallthrough
CT: control target
= control target key end

     0   :  { %12 = vsyncpa [#allocation3], 0  ;;  %s1342_s0 = inlined_call_operand.hbm [shape: f32[16,256], index: 0, kind: input, shape index: {}]   ;;  %s1343_s1 = inlined_call_operand.hbm [shape: f32[8,256], index: 1, kind: input, shape index: {}]   ;;  %s1344_s2 = inlined_call_operand.hbm [shape: f32[32,16], index: 2, kind: input, shape index: {}]   ;;  %s1345_s3 = inlined_call_operand.hbm [shape: f32[6,32,32], index: 3, kind: input, shape index: {}]   ;;  %s1346_s4 = inlined_call_operand.hbm [shape: f32[7,32,1], index: 4, kind: input, shape index: {}]   ;;  %s1347_s5 = inlined_call_operand.hbm [shape: f32[8,256], index: 5, kind: output, shape index: {0}]   ;;  %s1348_s6 = inlined_call_operand.hbm [shape: f32[1,1], index: 6, kind: output, shape index: {1}]  }
   0x1   :  { %13 = vsyncpa [#allocation7], 0 }
   0x2   :  { %14 = vsyncpa [#allocation10], 0 }
   0x3   :  { %15 = vsyncpa [#allocation4], 0  ;;  %s35_s23 = sshll.u32 %s1343_s1, 4  ;;  %s36_s23 = int_to_ptr.hbm [resolvable:$true] %s35_s23 }
   0x4   :  { %16 = vsyncpa [#allocation5], 0  ;;  %s1218_s24 = smov [#allocation6]   ;;  %s58_s28 = sshll.u32 %s1345_s3, 4  ;;  %s59_s28 = int_to_ptr.hbm [resolvable:$true] %s58_s28 }
   0x5   :  { %s37_s25 = sshll.u32 %s1218_s24, 4  ;;  %s1219_s29 = smov [#allocation9]   ;;  %s38_s25 = int_to_ptr.vmem [resolvable:$true] %s37_s25 }
   0x6   :  { %40 = dma.hbm_to_vmem [thread:$0]  %s36_s23, 256, %s38_s25, [#allocation7]  }
   0x7   :  { %s60_s30 = sshll.u32 %s1219_s29, 4  ;;  %s21_s9 = sshll.u32 %s1342_s0, 4  ;;  %s61_s30 = int_to_ptr.vmem [resolvable:$true] %s60_s30  ;;  %s22_s9 = int_to_ptr.hbm [resolvable:$true] %s21_s9 }
   0x8   :  { %s1220_s1 = smov 128   ;;  %s1221_s10 = smov 8  }
   0x9   :  { %66 = dma.hbm_to_vmem [thread:$0]  %s59_s28, 3072, %s61_s30, [#allocation10], %s1220_s1, %s1220_s1, %s1221_s10  }
   0xa   :  { %s1222_s11 = smov [#allocation2]   ;;  %s45_s15 = sshll.u32 %s1344_s2, 4  ;;  %s46_s15 = int_to_ptr.hbm [resolvable:$true] %s45_s15 }
   0xb   :  { %s23_s12 = sshll.u32 %s1222_s11, 4  ;;  %s1223_s3 = smov 256   ;;  %s24_s12 = int_to_ptr.vmem [resolvable:$true] %s23_s12 }
   0xc   :  { %s1224_s16 = smov 16   ;;  %s1225_s17 = smov [#allocation8]  }
   0xd   :  { %29 = dma.hbm_to_vmem [thread:$0]  %s22_s9, 512, %s24_s12, [#allocation3], %s1223_s3, %s1223_s3, %s1224_s16  }
   0xe   :  { %s47_s18 = sshll.u32 %s1225_s17, 4  ;;  %s71_s20 = sshll.u32 %s1346_s4, 4  ;;  %s48_s18 = int_to_ptr.vmem [resolvable:$true] %s47_s18  ;;  %s72_s20 = int_to_ptr.hbm [resolvable:$true] %s71_s20 }
   0xf   :  { %53 = dma.hbm_to_vmem [thread:$0]  %s46_s15, 512, %s48_s18, [#allocation7], %s1220_s1, %s1220_s1, %s1221_s10  }
  0x10   :  { %s1226_s21 = smov [#allocation11]  }
  0x11   :  { %s73_s22 = sshll.u32 %s1226_s21, 4  ;;  %s74_s22 = int_to_ptr.vmem [resolvable:$true] %s73_s22 }
  0x12   :  { %79 = dma.hbm_to_vmem [thread:$0]  %s72_s20, 3584, %s74_s22, [#allocation10], %s1220_s1, %s1220_s1, %s1221_s10  }
  0x13   :  { %1208 = dma.done.wait [#allocation3], 512  }
  0x14   :  { %1209 = vsyncadd [#allocation3], 4294966784 }
  0x15   :  { %1210 = dma.done.wait [#allocation7], 768  }
  0x16   :  { %1211 = vsyncadd [#allocation7], 4294966528 }
  0x17   :  { %1212 = dma.done.wait [#allocation10], 6656  }
  0x18   :  { %1213 = vsyncadd [#allocation10], 4294960640  ;;  %v1227_v0 = vmov 0   ;;  %v117_v1 = vld [vmem:[#allocation11 + $0x18] sm:$0xff]  ;;  %v115_v2 = vld [vmem:[#allocation11 + $0x8] sm:$0xff]  ;;  %vm138_vm0 = vcmask 130048  }
  0x19   :  { %986 = vset.pattern.permute.xlu1 %v1227_v0  ;;  %985 = vset.pattern.permute.xlu0 %v1227_v0  ;;  %v112_v3 = vld [vmem:[#allocation2 + $0x10] sm:$0xff]  ;;  %v113_v4 = vld [vmem:[#allocation2 + $0x18] sm:$0xff]  ;;  %v110_v5 = vld [vmem:[#allocation2] sm:$0xff]  ;;  %vm246_vm1 = vcmask 261120   ;;  %s883_s23 = sshll.u32 %s1347_s5, 4  ;;  %s1228_s24 = smov [#allocation12]   ;;  %s884_s23 = int_to_ptr.hbm [resolvable:$true] %s883_s23 }
  0x1a   :  { %987 = vset.pattern.permute.xlu2 %v1227_v0  ;;  %135 = vperm.xlu0 %985, %v117_v1   ;;  %v111_v6 = vld [vmem:[#allocation2 + $0x8] sm:$0xff]  ;;  %v108_v7 = vld [vmem:[#allocation8 + $0x10] sm:$0xff]  ;;  %v106_v8 = vld [vmem:[#allocation8] sm:$0xff]  ;;  %s881_s25 = sshll.u32 %s1228_s24, 4  ;;  %s892_s27 = sshll.u32 %s1348_s6, 4  ;;  %s882_s25 = int_to_ptr.vmem [resolvable:$true] %s881_s25  ;;  %s893_s27 = int_to_ptr.hbm [resolvable:$true] %s892_s27 }
  0x1b   :  { %125 = vperm.xlu1 %986, %v115_v2   ;;  %966 = vmatpush.msra.mxu2 %v112_v3  ;;  %v116_v9 = vld [vmem:[#allocation11 + $0x10] sm:$0xff]  ;;  %v114_v10 = vld [vmem:[#allocation11] sm:$0xff]  ;;  %v109_v11 = vld [vmem:[#allocation8 + $0x18] sm:$0xff]  ;;  %s1229_s30 = smov [#allocation13]  }
  0x1c   :  { %968 = vmatpush.msra.mxu3 %v113_v4  ;;  %165 = vmatpush.msra.mxu0 %v112_v3  ;;  %v107_v12 = vld [vmem:[#allocation8 + $0x8] sm:$0xff]  ;;  %v222_v14 = vld [vmem:[#allocation11 + $0x20] sm:$0xff]  ;;  %v333_v15 = vld [vmem:[#allocation11 + $0x50] sm:$0xff] }
  0x1d   :  { %194 = vmatpush.msra.mxu1 %v113_v4  ;;  %967 = vmatpush.msra.mxu2 %v110_v5  ;;  %v223_v13 = vld [vmem:[#allocation11 + $0x28] sm:$0xff]  ;;  %v442_v17 = vld [vmem:[#allocation11 + $0x78] sm:$0xff]  ;;  %v441_v18 = vld [vmem:[#allocation11 + $0x70] sm:$0xff] }
  0x1e   :  { %969 = vmatpush.msra.mxu3 %v111_v6  ;;  %912 = vmatmul.msk.f32.vlgmr.msra.gmra.mxu2 %vm138_vm0, %v108_v7  ;;  %v332_v16 = vld [vmem:[#allocation11 + $0x48] sm:$0xff]  ;;  %v439_v19 = vld [vmem:[#allocation11 + $0x60] sm:$0xff]  ;;  %v550_v20 = vld [vmem:[#allocation11 + $0x98] sm:$0xff] }
  0x1f   :  { %916 = vmatmul.msk.f32.vlgmr.msra.gmra.mxu3 %vm138_vm0, %v108_v7  ;;  %166 = vmatpush.msra.mxu0 %v110_v5  ;;  %v548_v21 = vld [vmem:[#allocation11 + $0x88] sm:$0xff]  ;;  %v547_v22 = vld [vmem:[#allocation11 + $0x80] sm:$0xff]  ;;  %v657_v23 = vld [vmem:[#allocation11 + $0xb0] sm:$0xff] }
  0x20   :  { %195 = vmatpush.msra.mxu1 %v111_v6  ;;  %910 = vmatmul.msk.f32.vlgmr.msra.gmra.mxu0 %vm138_vm0, %v106_v8  ;;  %v656_v24 = vld [vmem:[#allocation11 + $0xa8] sm:$0xff]  ;;  %v763_v25 = vld [vmem:[#allocation11 + $0xc0] sm:$0xff]  ;;  %v225_v26 = vld [vmem:[#allocation11 + $0x38] sm:$0xff] }
  0x21   :  { %914 = vmatmul.msk.f32.vlgmr.msra.gmra.mxu1 %vm138_vm0, %v106_v8  ;;  %243 = vperm.xlu2 %987, %v225_v26   ;;  %v224_v33 = vld [vmem:[#allocation11 + $0x30] sm:$0xff]  ;;  %v334_v43 = vld [vmem:[#allocation11 + $0x58] sm:$0xff]  ;;  %v331_v51 = vld [vmem:[#allocation11 + $0x40] sm:$0xff] }
  0x22   :  { %130 = vperm.xlu0 %985, %v116_v9   ;;  %v217_v56 = vld [vmem:[#allocation9] sm:$0xff]  ;;  %v440_v59 = vld [vmem:[#allocation11 + $0x68] sm:$0xff]  ;;  %v549_v61 = vld [vmem:[#allocation11 + $0x90] sm:$0xff] }
  0x23   :  { %120 = vperm.xlu1 %986, %v114_v10   ;;  %v218_v60 = vld [vmem:[#allocation9 + $0x8] sm:$0xff]  ;;  %v219_v62 = vld [vmem:[#allocation9 + $0x10] sm:$0xff]  ;;  %v658_v63 = vld [vmem:[#allocation11 + $0xb8] sm:$0xff] }
  0x24   :  { %v220_v0 = vld [vmem:[#allocation9 + $0x18] sm:$0xff]  ;;  %v655_v1 = vld [vmem:[#allocation11 + $0xa0] sm:$0xff] }
  0x26   :  { %913 = vmatmul.msk.f32.gmra.mxu2 %vm138_vm0, %v109_v11 }
  0x27   :  { %917 = vmatmul.msk.f32.gmra.mxu3 %vm138_vm0, %v109_v11 }
  0x28   :  { %911 = vmatmul.msk.f32.gmra.mxu0 %vm138_vm0, %v107_v12 }
  0x29   :  { %915 = vmatmul.msk.f32.gmra.mxu1 %vm138_vm0, %v107_v12  ;;  %238 = vperm.xlu2 %987, %v224_v33   ;;  %v329_v33 = vld [vmem:[#allocation9 + $0x38] sm:$0xff] }
  0x2a   :  { %233 = vperm.xlu0 %985, %v223_v13  }
  0x2b   :  { %228 = vperm.xlu1 %986, %v222_v14  }
  0x31   :  { %352 = vperm.xlu2 %987, %v334_v43  }
  0x32   :  { %347 = vperm.xlu0 %985, %v333_v15  }
  0x33   :  { %342 = vperm.xlu1 %986, %v332_v16  }
  0x39   :  { %337 = vperm.xlu2 %987, %v331_v51  }
  0x3a   :  { %460 = vperm.xlu0 %985, %v442_v17  }
  0x3b   :  { %455 = vperm.xlu1 %986, %v441_v18  }
  0x41   :  { %450 = vperm.xlu2 %987, %v440_v59  }
  0x42   :  { %445 = vperm.xlu0 %985, %v439_v19  }
  0x43   :  { %568 = vperm.xlu1 %986, %v550_v20  }
  0x49   :  { %563 = vperm.xlu2 %987, %v549_v61   ;;  %v434_v61 = vld [vmem:[#allocation9 + $0x40] sm:$0xff] }
  0x4a   :  { %558 = vperm.xlu0 %985, %v548_v21  }
  0x4b   :  { %553 = vperm.xlu1 %986, %v547_v22  }
  0x51   :  { %676 = vperm.xlu2 %987, %v658_v63   ;;  %v435_v63 = vld [vmem:[#allocation9 + $0x48] sm:$0xff] }
  0x52   :  { %671 = vperm.xlu0 %985, %v657_v23  }
  0x53   :  { %666 = vperm.xlu1 %986, %v656_v24  }
  0x59   :  { %661 = vperm.xlu2 %987, %v655_v1   ;;  %v437_v1 = vld [vmem:[#allocation9 + $0x58] sm:$0xff] }
  0x5a   :  { %769 = vperm.xlu0 %985, %v763_v25  }
  0x7b   :  { %v244_v6 = vpop.permute.xlu2 %243 }
  0x83   :  { %v239_v9 = vpop.permute.xlu2 %238 }
  0x8c   :  { %v136_v27 = vpop.permute.xlu0 %135 }
  0x8d   :  { %v126_v32 = vpop.permute.xlu1 %125 }
  0x94   :  { %v131_v34 = vpop.permute.xlu0 %130 }
  0x95   :  { %v121_v45 = vpop.permute.xlu1 %120 }
  0x9c   :  { %v234_v14 = vpop.permute.xlu0 %233 }
  0x9d   :  { %v168_v28 = vpop.f32.mrf.mxu0  ;;  %v229_v18 = vpop.permute.xlu1 %228 }
  0x9e   :  { %v197_v29 = vpop.f32.mrf.mxu1  ;;  %v169_v47 = vadd.f32 %v168_v28, %v121_v45  ;;  %v326_v28 = vld [vmem:[#allocation9 + $0x20] sm:$0xff] }
  0x9f   :  { %v198_v48 = vadd.f32 %v197_v29, %v121_v45 }
  0xa1   :  { %v174_v30 = vpop.f32.mrf.mxu2 }
  0xa2   :  { %v203_v31 = vpop.f32.mrf.mxu3  ;;  %v175_v38 = vadd.f32 %v174_v30, %v131_v34 }
  0xa3   :  { %v204_v42 = vadd.f32 %v203_v31, %v131_v34  ;;  %v327_v31 = vld [vmem:[#allocation9 + $0x28] sm:$0xff] }
  0xa5   :  { %v171_v35 = vpop.f32.mrf.mxu0 }
  0xa6   :  { %v200_v39 = vpop.f32.mrf.mxu1  ;;  %v172_v44 = vadd.f32 %v171_v35, %v126_v32 }
  0xa7   :  { %v201_v46 = vadd.f32 %v200_v39, %v126_v32  ;;  %v328_v32 = vld [vmem:[#allocation9 + $0x30] sm:$0xff] }
  0xa9   :  { %v177_v36 = vpop.f32.mrf.mxu2 }
  0xaa   :  { %v206_v37 = vpop.f32.mrf.mxu3  ;;  %v178_v40 = vadd.f32 %v177_v36, %v136_v27 }
  0xab   :  { %v207_v41 = vadd.f32 %v206_v37, %v136_v27 }
  0xac   :  { %988 = vtanh.f32 %v178_v40  ;;  %v353_v40 = vpop.permute.xlu2 %352 }
  0xad   :  { %990 = vtanh.f32 %v207_v41  ;;  %v348_v41 = vpop.permute.xlu0 %347 }
  0xae   :  { %992 = vtanh.f32 %v175_v38 }
  0xaf   :  { %994 = vtanh.f32 %v204_v42 }
  0xb0   :  { %996 = vtanh.f32 %v172_v44 }
  0xb1   :  { %998 = vtanh.f32 %v201_v46  ;;  %v343_v46 = vpop.permute.xlu1 %342 }
  0xb2   :  { %v989_v49 = vpop.eup %988  ;;  %1000 = vtanh.f32 %v169_v47 }
  0xb3   :  { %v991_v50 = vpop.eup %990  ;;  %1002 = vtanh.f32 %v198_v48  ;;  %271 = vmatpush.msrb.mxu2 %v989_v49 }
  0xb4   :  { %v993_v52 = vpop.eup %992  ;;  %300 = vmatpush.msrb.mxu3 %v991_v50  ;;  %v338_v51 = vpop.permute.xlu2 %337 }
  0xb5   :  { %v995_v53 = vpop.eup %994  ;;  %272 = vmatpush.msrb.mxu2 %v993_v52 }
  0xb6   :  { %v997_v54 = vpop.eup %996  ;;  %301 = vmatpush.msrb.mxu3 %v995_v53 }
  0xb7   :  { %v999_v55 = vpop.eup %998  ;;  %273 = vmatpush.msrb.mxu2 %v997_v54 }
  0xb8   :  { %v1001_v57 = vpop.eup %1000  ;;  %302 = vmatpush.msrb.mxu3 %v999_v55 }
  0xb9   :  { %v1003_v58 = vpop.eup %1002  ;;  %274 = vmatpush.msrb.mxu2 %v1001_v57 }
  0xba   :  { %303 = vmatpush.msrb.mxu3 %v1003_v58  ;;  %918 = vmatmul.msk.f32.vlgmr.msrb.gmra.mxu2 %vm246_vm1, %v217_v56 }
  0xbb   :  { %922 = vmatmul.msk.f32.vlgmr.msrb.gmra.mxu3 %vm246_vm1, %v217_v56 }
  0xc2   :  { %919 = vmatmul.msk.f32.gmra.mxu2 %vm246_vm1, %v218_v60 }
  0xc3   :  { %923 = vmatmul.msk.f32.gmra.mxu3 %vm246_vm1, %v218_v60 }
  0xca   :  { %920 = vmatmul.msk.f32.gmra.mxu2 %vm246_vm1, %v219_v62 }
  0xcb   :  { %924 = vmatmul.msk.f32.gmra.mxu3 %vm246_vm1, %v219_v62 }
  0xd2   :  { %921 = vmatmul.msk.f32.gmra.mxu2 %vm246_vm1, %v220_v0 }
  0xd3   :  { %925 = vmatmul.msk.f32.gmra.mxu3 %vm246_vm1, %v220_v0  ;;  %v436_v0 = vld [vmem:[#allocation9 + $0x50] sm:$0xff] }
 0x13d   :  { %v276_v2 = vpop.f32.mrf.mxu2 }
 0x13e   :  { %v305_v3 = vpop.f32.mrf.mxu3  ;;  %v277_v20 = vadd.f32 %v276_v2, %v229_v18 }
 0x13f   :  { %v306_v21 = vadd.f32 %v305_v3, %v229_v18 }
 0x145   :  { %v279_v4 = vpop.f32.mrf.mxu2 }
 0x146   :  { %v308_v5 = vpop.f32.mrf.mxu3  ;;  %v280_v17 = vadd.f32 %v279_v4, %v234_v14 }
 0x147   :  { %v309_v19 = vadd.f32 %v308_v5, %v234_v14  ;;  %v451_v14 = vpop.permute.xlu2 %450 }
 0x14d   :  { %v282_v7 = vpop.f32.mrf.mxu2 }
 0x14e   :  { %v311_v8 = vpop.f32.mrf.mxu3  ;;  %v283_v11 = vadd.f32 %v282_v7, %v239_v9 }
 0x14f   :  { %v312_v15 = vadd.f32 %v311_v8, %v239_v9  ;;  %v461_v8 = vpop.permute.xlu0 %460  ;;  %v456_v9 = vpop.permute.xlu1 %455 }
 0x155   :  { %v285_v10 = vpop.f32.mrf.mxu2 }
 0x156   :  { %v286_v12 = vadd.f32 %v285_v10, %v244_v6  ;;  %v314_v13 = vpop.f32.mrf.mxu3 }
 0x157   :  { %v315_v16 = vadd.f32 %v314_v13, %v244_v6 }
 0x158   :  { %1004 = vtanh.f32 %v286_v12 }
 0x159   :  { %1006 = vtanh.f32 %v315_v16 }
 0x15a   :  { %1008 = vtanh.f32 %v283_v11 }
 0x15b   :  { %1010 = vtanh.f32 %v312_v15 }
 0x15c   :  { %1012 = vtanh.f32 %v280_v17 }
 0x15d   :  { %1014 = vtanh.f32 %v309_v19  ;;  %v446_v19 = vpop.permute.xlu0 %445 }
 0x15e   :  { %v1005_v22 = vpop.eup %1004  ;;  %1016 = vtanh.f32 %v277_v20 }
 0x15f   :  { %v1007_v23 = vpop.eup %1006  ;;  %1018 = vtanh.f32 %v306_v21  ;;  %379 = vmatpush.msrb.mxu0 %v1005_v22 }
 0x160   :  { %v1009_v24 = vpop.eup %1008  ;;  %408 = vmatpush.msrb.mxu1 %v1007_v23 }
 0x161   :  { %v1011_v25 = vpop.eup %1010  ;;  %380 = vmatpush.msrb.mxu0 %v1009_v24 }
 0x162   :  { %v1013_v26 = vpop.eup %1012  ;;  %409 = vmatpush.msrb.mxu1 %v1011_v25 }
 0x163   :  { %v1015_v27 = vpop.eup %1014  ;;  %381 = vmatpush.msrb.mxu0 %v1013_v26 }
 0x164   :  { %v1017_v29 = vpop.eup %1016  ;;  %410 = vmatpush.msrb.mxu1 %v1015_v27 }
 0x165   :  { %v1019_v30 = vpop.eup %1018  ;;  %382 = vmatpush.msrb.mxu0 %v1017_v29  ;;  %v542_v29 = vld [vmem:[#allocation9 + $0x60] sm:$0xff] }
 0x166   :  { %411 = vmatpush.msrb.mxu1 %v1019_v30  ;;  %926 = vmatmul.msk.f32.vlgmr.msrb.gmra.mxu0 %vm246_vm1, %v326_v28 }
 0x167   :  { %930 = vmatmul.msk.f32.vlgmr.msrb.gmra.mxu1 %vm246_vm1, %v326_v28 }
 0x16e   :  { %927 = vmatmul.msk.f32.gmra.mxu0 %vm246_vm1, %v327_v31 }
 0x16f   :  { %931 = vmatmul.msk.f32.gmra.mxu1 %vm246_vm1, %v327_v31  ;;  %v543_v31 = vld [vmem:[#allocation9 + $0x68] sm:$0xff] }
 0x176   :  { %928 = vmatmul.msk.f32.gmra.mxu0 %vm246_vm1, %v328_v32 }
 0x177   :  { %932 = vmatmul.msk.f32.gmra.mxu1 %vm246_vm1, %v328_v32  ;;  %v544_v32 = vld [vmem:[#allocation9 + $0x70] sm:$0xff] }
 0x17e   :  { %929 = vmatmul.msk.f32.gmra.mxu0 %vm246_vm1, %v329_v33 }
 0x17f   :  { %933 = vmatmul.msk.f32.gmra.mxu1 %vm246_vm1, %v329_v33  ;;  %v545_v33 = vld [vmem:[#allocation9 + $0x78] sm:$0xff] }
 0x1e3   :  { %v384_v34 = vpop.f32.mrf.mxu0 }
 0x1e4   :  { %v413_v35 = vpop.f32.mrf.mxu1  ;;  %v385_v54 = vadd.f32 %v384_v34, %v338_v51 }
 0x1e5   :  { %v414_v56 = vadd.f32 %v413_v35, %v338_v51 }
 0x1e6   :  { %v425_v60 = vmax.f32 %v385_v54, 0.0 }
 0x1e7   :  { %v426_v62 = vmax.f32 %v414_v56, 0.0 }
 0x1eb   :  { %v387_v36 = vpop.f32.mrf.mxu0 }
 0x1ec   :  { %v416_v37 = vpop.f32.mrf.mxu1  ;;  %v388_v49 = vadd.f32 %v387_v36, %v343_v46 }
 0x1ed   :  { %v417_v52 = vadd.f32 %v416_v37, %v343_v46  ;;  %v559_v46 = vpop.permute.xlu0 %558 }
 0x1ee   :  { %v427_v58 = vmax.f32 %v388_v49, 0.0 }
 0x1ef   :  { %v428_v59 = vmax.f32 %v417_v52, 0.0 }
 0x1f3   :  { %v390_v38 = vpop.f32.mrf.mxu0 }
 0x1f4   :  { %v419_v39 = vpop.f32.mrf.mxu1  ;;  %v391_v43 = vadd.f32 %v390_v38, %v348_v41 }
 0x1f5   :  { %v420_v47 = vadd.f32 %v419_v39, %v348_v41  ;;  %v564_v41 = vpop.permute.xlu2 %563 }
 0x1f6   :  { %v429_v55 = vmax.f32 %v391_v43, 0.0 }
 0x1f7   :  { %v430_v57 = vmax.f32 %v420_v47, 0.0 }
 0x1fb   :  { %v393_v42 = vpop.f32.mrf.mxu0 }
 0x1fc   :  { %v394_v44 = vadd.f32 %v393_v42, %v353_v40  ;;  %v422_v45 = vpop.f32.mrf.mxu1 }
 0x1fd   :  { %v423_v48 = vadd.f32 %v422_v45, %v353_v40  ;;  %v569_v40 = vpop.permute.xlu1 %568 }
 0x1fe   :  { %v431_v50 = vmax.f32 %v394_v44, 0.0 }
 0x1ff   :  { %v432_v53 = vmax.f32 %v423_v48, 0.0 }
 0x200   :  { %487 = vmatpush.msra.mxu2 %v431_v50 }
 0x201   :  { %516 = vmatpush.msra.mxu3 %v432_v53 }
 0x202   :  { %488 = vmatpush.msra.mxu2 %v429_v55 }
 0x203   :  { %517 = vmatpush.msra.mxu3 %v430_v57 }
 0x204   :  { %489 = vmatpush.msra.mxu2 %v427_v58 }
 0x205   :  { %518 = vmatpush.msra.mxu3 %v428_v59  ;;  %v554_v50 = vpop.permute.xlu1 %553 }
 0x206   :  { %490 = vmatpush.msra.mxu2 %v425_v60  ;;  %v650_v60 = vld [vmem:[#allocation9 + $0x80] sm:$0xff] }
 0x207   :  { %519 = vmatpush.msra.mxu3 %v426_v62  ;;  %934 = vmatmul.msk.f32.vlgmr.msra.gmra.mxu2 %vm246_vm1, %v434_v61 }
 0x208   :  { %938 = vmatmul.msk.f32.vlgmr.msra.gmra.mxu3 %vm246_vm1, %v434_v61 }
 0x20f   :  { %935 = vmatmul.msk.f32.gmra.mxu2 %vm246_vm1, %v435_v63 }
 0x210   :  { %939 = vmatmul.msk.f32.gmra.mxu3 %vm246_vm1, %v435_v63  ;;  %v651_v63 = vld [vmem:[#allocation9 + $0x88] sm:$0xff] }
 0x217   :  { %936 = vmatmul.msk.f32.gmra.mxu2 %vm246_vm1, %v436_v0 }
 0x218   :  { %940 = vmatmul.msk.f32.gmra.mxu3 %vm246_vm1, %v436_v0  ;;  %v652_v0 = vld [vmem:[#allocation9 + $0x90] sm:$0xff] }
 0x21f   :  { %937 = vmatmul.msk.f32.gmra.mxu2 %vm246_vm1, %v437_v1 }
 0x220   :  { %941 = vmatmul.msk.f32.gmra.mxu3 %vm246_vm1, %v437_v1  ;;  %v653_v1 = vld [vmem:[#allocation9 + $0x98] sm:$0xff] }
 0x28a   :  { %v492_v2 = vpop.f32.mrf.mxu2 }
 0x28b   :  { %v521_v3 = vpop.f32.mrf.mxu3  ;;  %v493_v22 = vadd.f32 %v492_v2, %v446_v19 }
 0x28c   :  { %v522_v24 = vadd.f32 %v521_v3, %v446_v19 }
 0x28d   :  { %v533_v28 = vmax.f32 %v493_v22, 0.0 }
 0x28e   :  { %v534_v30 = vmax.f32 %v522_v24, 0.0 }
 0x292   :  { %v495_v4 = vpop.f32.mrf.mxu2 }
 0x293   :  { %v524_v5 = vpop.f32.mrf.mxu3  ;;  %v496_v17 = vadd.f32 %v495_v4, %v451_v14 }
 0x294   :  { %v525_v20 = vadd.f32 %v524_v5, %v451_v14  ;;  %v667_v14 = vpop.permute.xlu1 %666 }
 0x295   :  { %v535_v26 = vmax.f32 %v496_v17, 0.0 }
 0x296   :  { %v536_v27 = vmax.f32 %v525_v20, 0.0 }
 0x29a   :  { %v498_v6 = vpop.f32.mrf.mxu2 }
 0x29b   :  { %v527_v7 = vpop.f32.mrf.mxu3  ;;  %v499_v11 = vadd.f32 %v498_v6, %v456_v9 }
 0x29c   :  { %v528_v15 = vadd.f32 %v527_v7, %v456_v9  ;;  %v672_v9 = vpop.permute.xlu0 %671 }
 0x29d   :  { %v537_v23 = vmax.f32 %v499_v11, 0.0 }
 0x29e   :  { %v538_v25 = vmax.f32 %v528_v15, 0.0 }
 0x2a2   :  { %v501_v10 = vpop.f32.mrf.mxu2 }
 0x2a3   :  { %v502_v12 = vadd.f32 %v501_v10, %v461_v8  ;;  %v530_v13 = vpop.f32.mrf.mxu3 }
 0x2a4   :  { %v531_v16 = vadd.f32 %v530_v13, %v461_v8  ;;  %v677_v8 = vpop.permute.xlu2 %676 }
 0x2a5   :  { %v539_v18 = vmax.f32 %v502_v12, 0.0 }
 0x2a6   :  { %v540_v21 = vmax.f32 %v531_v16, 0.0 }
 0x2a7   :  { %595 = vmatpush.msra.mxu0 %v539_v18 }
 0x2a8   :  { %624 = vmatpush.msra.mxu1 %v540_v21 }
 0x2a9   :  { %596 = vmatpush.msra.mxu0 %v537_v23 }
 0x2aa   :  { %625 = vmatpush.msra.mxu1 %v538_v25 }
 0x2ab   :  { %597 = vmatpush.msra.mxu0 %v535_v26 }
 0x2ac   :  { %626 = vmatpush.msra.mxu1 %v536_v27  ;;  %v662_v18 = vpop.permute.xlu2 %661 }
 0x2ad   :  { %598 = vmatpush.msra.mxu0 %v533_v28  ;;  %v758_v28 = vld [vmem:[#allocation9 + $0xa0] sm:$0xff] }
 0x2ae   :  { %627 = vmatpush.msra.mxu1 %v534_v30  ;;  %942 = vmatmul.msk.f32.vlgmr.msra.gmra.mxu0 %vm246_vm1, %v542_v29 }
 0x2af   :  { %946 = vmatmul.msk.f32.vlgmr.msra.gmra.mxu1 %vm246_vm1, %v542_v29 }
 0x2b6   :  { %943 = vmatmul.msk.f32.gmra.mxu0 %vm246_vm1, %v543_v31 }
 0x2b7   :  { %947 = vmatmul.msk.f32.gmra.mxu1 %vm246_vm1, %v543_v31  ;;  %v759_v31 = vld [vmem:[#allocation9 + $0xa8] sm:$0xff] }
 0x2be   :  { %944 = vmatmul.msk.f32.gmra.mxu0 %vm246_vm1, %v544_v32 }
 0x2bf   :  { %948 = vmatmul.msk.f32.gmra.mxu1 %vm246_vm1, %v544_v32  ;;  %v760_v32 = vld [vmem:[#allocation9 + $0xb0] sm:$0xff] }
 0x2c6   :  { %945 = vmatmul.msk.f32.gmra.mxu0 %vm246_vm1, %v545_v33 }
 0x2c7   :  { %949 = vmatmul.msk.f32.gmra.mxu1 %vm246_vm1, %v545_v33  ;;  %v761_v33 = vld [vmem:[#allocation9 + $0xb8] sm:$0xff] }
 0x32b   :  { %v600_v34 = vpop.f32.mrf.mxu0 }
 0x32c   :  { %v629_v35 = vpop.f32.mrf.mxu1  ;;  %v601_v52 = vadd.f32 %v600_v34, %v554_v50  ;;  %v770_v34 = vpop.permute.xlu0 %769 }
 0x32d   :  { %v630_v53 = vadd.f32 %v629_v35, %v554_v50 }
 0x333   :  { %v603_v36 = vpop.f32.mrf.mxu0 }
 0x334   :  { %v632_v37 = vpop.f32.mrf.mxu1  ;;  %v604_v49 = vadd.f32 %v603_v36, %v559_v46  ;;  %v850_v36 = vld [vmem:[#allocation6] sm:$0xff] }
 0x335   :  { %v633_v51 = vadd.f32 %v632_v37, %v559_v46 }
 0x33b   :  { %v606_v38 = vpop.f32.mrf.mxu0 }
 0x33c   :  { %v635_v39 = vpop.f32.mrf.mxu1  ;;  %v607_v43 = vadd.f32 %v606_v38, %v564_v41 }
 0x33d   :  { %v636_v47 = vadd.f32 %v635_v39, %v564_v41  ;;  %v851_v39 = vld [vmem:[#allocation6 + $0x8] sm:$0xff] }
 0x343   :  { %v609_v42 = vpop.f32.mrf.mxu0 }
 0x344   :  { %v610_v44 = vadd.f32 %v609_v42, %v569_v40  ;;  %v638_v45 = vpop.f32.mrf.mxu1 }
 0x345   :  { %v639_v48 = vadd.f32 %v638_v45, %v569_v40 }
 0x346   :  { %1020 = vtanh.f32 %v610_v44 }
 0x347   :  { %1022 = vtanh.f32 %v639_v48 }
 0x348   :  { %1024 = vtanh.f32 %v607_v43 }
 0x349   :  { %1026 = vtanh.f32 %v636_v47 }
 0x34a   :  { %1028 = vtanh.f32 %v604_v49 }
 0x34b   :  { %1030 = vtanh.f32 %v633_v51 }
 0x34c   :  { %v1021_v54 = vpop.eup %1020  ;;  %1032 = vtanh.f32 %v601_v52 }
 0x34d   :  { %v1023_v55 = vpop.eup %1022  ;;  %1034 = vtanh.f32 %v630_v53  ;;  %703 = vmatpush.msrb.mxu2 %v1021_v54 }
 0x34e   :  { %v1025_v56 = vpop.eup %1024  ;;  %732 = vmatpush.msrb.mxu3 %v1023_v55 }
 0x34f   :  { %v1027_v57 = vpop.eup %1026  ;;  %704 = vmatpush.msrb.mxu2 %v1025_v56 }
 0x350   :  { %v1029_v58 = vpop.eup %1028  ;;  %733 = vmatpush.msrb.mxu3 %v1027_v57 }
 0x351   :  { %v1031_v59 = vpop.eup %1030  ;;  %705 = vmatpush.msrb.mxu2 %v1029_v58 }
 0x352   :  { %v1033_v61 = vpop.eup %1032  ;;  %734 = vmatpush.msrb.mxu3 %v1031_v59 }
 0x353   :  { %v1035_v62 = vpop.eup %1034  ;;  %706 = vmatpush.msrb.mxu2 %v1033_v61 }
 0x354   :  { %735 = vmatpush.msrb.mxu3 %v1035_v62  ;;  %950 = vmatmul.msk.f32.vlgmr.msrb.gmra.mxu2 %vm246_vm1, %v650_v60 }
 0x355   :  { %954 = vmatmul.msk.f32.vlgmr.msrb.gmra.mxu3 %vm246_vm1, %v650_v60 }
 0x35c   :  { %951 = vmatmul.msk.f32.gmra.mxu2 %vm246_vm1, %v651_v63 }
 0x35d   :  { %955 = vmatmul.msk.f32.gmra.mxu3 %vm246_vm1, %v651_v63 }
 0x364   :  { %952 = vmatmul.msk.f32.gmra.mxu2 %vm246_vm1, %v652_v0 }
 0x365   :  { %956 = vmatmul.msk.f32.gmra.mxu3 %vm246_vm1, %v652_v0 }
 0x36c   :  { %953 = vmatmul.msk.f32.gmra.mxu2 %vm246_vm1, %v653_v1 }
 0x36d   :  { %957 = vmatmul.msk.f32.gmra.mxu3 %vm246_vm1, %v653_v1 }
 0x3d7   :  { %v708_v2 = vpop.f32.mrf.mxu2 }
 0x3d8   :  { %v737_v3 = vpop.f32.mrf.mxu3  ;;  %v709_v20 = vadd.f32 %v708_v2, %v662_v18 }
 0x3d9   :  { %v738_v21 = vadd.f32 %v737_v3, %v662_v18 }
 0x3df   :  { %v711_v4 = vpop.f32.mrf.mxu2 }
 0x3e0   :  { %v740_v5 = vpop.f32.mrf.mxu3  ;;  %v712_v17 = vadd.f32 %v711_v4, %v667_v14 }
 0x3e1   :  { %v741_v19 = vadd.f32 %v740_v5, %v667_v14 }
 0x3e7   :  { %v714_v6 = vpop.f32.mrf.mxu2 }
 0x3e8   :  { %v743_v7 = vpop.f32.mrf.mxu3  ;;  %v715_v11 = vadd.f32 %v714_v6, %v672_v9 }
 0x3e9   :  { %v744_v15 = vadd.f32 %v743_v7, %v672_v9 }
 0x3ef   :  { %v717_v10 = vpop.f32.mrf.mxu2 }
 0x3f0   :  { %v718_v12 = vadd.f32 %v717_v10, %v677_v8  ;;  %v746_v13 = vpop.f32.mrf.mxu3 }
 0x3f1   :  { %v747_v16 = vadd.f32 %v746_v13, %v677_v8 }
 0x3f2   :  { %1036 = vtanh.f32 %v718_v12 }
 0x3f3   :  { %1038 = vtanh.f32 %v747_v16 }
 0x3f4   :  { %1040 = vtanh.f32 %v715_v11 }
 0x3f5   :  { %1042 = vtanh.f32 %v744_v15 }
 0x3f6   :  { %1044 = vtanh.f32 %v712_v17 }
 0x3f7   :  { %1046 = vtanh.f32 %v741_v19 }
 0x3f8   :  { %v1037_v22 = vpop.eup %1036  ;;  %1048 = vtanh.f32 %v709_v20 }
 0x3f9   :  { %v1039_v23 = vpop.eup %1038  ;;  %1050 = vtanh.f32 %v738_v21  ;;  %808 = vmatpush.msrb.mxu0 %v1037_v22 }
 0x3fa   :  { %v1041_v24 = vpop.eup %1040  ;;  %834 = vmatpush.msrb.mxu1 %v1039_v23 }
 0x3fb   :  { %v1043_v25 = vpop.eup %1042  ;;  %809 = vmatpush.msrb.mxu0 %v1041_v24 }
 0x3fc   :  { %v1045_v26 = vpop.eup %1044  ;;  %835 = vmatpush.msrb.mxu1 %v1043_v25 }
 0x3fd   :  { %v1047_v27 = vpop.eup %1046  ;;  %810 = vmatpush.msrb.mxu0 %v1045_v26 }
 0x3fe   :  { %v1049_v29 = vpop.eup %1048  ;;  %836 = vmatpush.msrb.mxu1 %v1047_v27 }
 0x3ff   :  { %v1051_v30 = vpop.eup %1050  ;;  %811 = vmatpush.msrb.mxu0 %v1049_v29 }
 0x400   :  { %837 = vmatpush.msrb.mxu1 %v1051_v30  ;;  %958 = vmatmul.msk.f32.vlgmr.msrb.gmra.mxu0 %vm246_vm1, %v758_v28 }
 0x401   :  { %962 = vmatmul.msk.f32.vlgmr.msrb.gmra.mxu1 %vm246_vm1, %v758_v28 }
 0x408   :  { %959 = vmatmul.msk.f32.gmra.mxu0 %vm246_vm1, %v759_v31 }
 0x409   :  { %963 = vmatmul.msk.f32.gmra.mxu1 %vm246_vm1, %v759_v31 }
 0x410   :  { %960 = vmatmul.msk.f32.gmra.mxu0 %vm246_vm1, %v760_v32 }
 0x411   :  { %964 = vmatmul.msk.f32.gmra.mxu1 %vm246_vm1, %v760_v32 }
 0x418   :  { %961 = vmatmul.msk.f32.gmra.mxu0 %vm246_vm1, %v761_v33 }
 0x419   :  { %965 = vmatmul.msk.f32.gmra.mxu1 %vm246_vm1, %v761_v33 }
 0x47d   :  { %v813_v35 = vpop.f32.mrf.mxu0 }
 0x47e   :  { %v814_v37 = vadd.f32 %v813_v35, %v770_v34  ;;  %v839_v38 = vpop.f32.mrf.mxu1 }
 0x47f   :  { %v840_v40 = vadd.f32 %v839_v38, %v770_v34 }
 0x480   :  { %848 = vst [vmem:[#allocation12] sm:$0xff] %v814_v37  ;;  %v852_v41 = vsub.f32 %v814_v37, %v850_v36 }
 0x481   :  { %849 = vst [vmem:[#allocation12 + $0x8] sm:$0xff] %v840_v40  ;;  %v853_v42 = vsub.f32 %v840_v40, %v851_v39 }
 0x482   :  { %v855_v43 = vmul.f32 %v852_v41, %v852_v41  ;;  %886 = dma.vmem_to_hbm [thread:$0]  %s882_s25, 256, %s884_s23, [#allocation4]  }
 0x483   :  { %v856_v44 = vmul.f32 %v853_v42, %v853_v42 }
 0x485   :  { %v857_v45 = vadd.f32 %v856_v44, %v855_v43  ;;  %v816_v46 = vpop.f32.mrf.mxu0 }
 0x486   :  { %v842_v47 = vpop.f32.mrf.mxu1 }
 0x487   :  { %858 = vadd.xlane.f32.xlu1 %v857_v45 }
 0x48d   :  { %v818_v48 = vpop.f32.mrf.mxu0 }
 0x48e   :  { %v844_v49 = vpop.f32.mrf.mxu1 }
 0x495   :  { %v820_v50 = vpop.f32.mrf.mxu0 }
 0x496   :  { %v846_v51 = vpop.f32.mrf.mxu1 }
 0x4fa   :  { %v859_v52 = vpop.xlane.xlu1 %858 }
 0x4fb   :  { %v860_v53 = vrot.slane %v859_v52, 4 }
 0x4fd   :  { %v861_v54 = vadd.f32 %v860_v53, %v859_v52 }
 0x4ff   :  { %v862_v55 = vrot.slane %v861_v54, 2 }
 0x501   :  { %v863_v56 = vadd.f32 %v862_v55, %v861_v54 }
 0x503   :  { %v864_v57 = vrot.slane %v863_v56, 1 }
 0x505   :  { %v865_v58 = vadd.f32 %v864_v57, %v863_v56 }
 0x507   :  { %970 = vpush %v865_v58 }
 0x538   :  { %s971_s28 = spop %970 }
 0x539   :  { %s874_s29 = smul.f32 0.00048828125, %s971_s28 }
 0x53b   :  { %875 = sst [smem:[#allocation13]] %s874_s29 }
 0x53c   :  { %895 = dma.smem_to_hbm %s1229_s30, 16, %s893_s27, [#allocation5]  }
 0x53d   :  { %1214 = dma.done.wait [#allocation4], 256  }
 0x53e   :  { %1215 = vsyncadd [#allocation4], 4294967040 }
 0x53f   :  { %1216 = dma.done.wait [#allocation5], 16  }
 0x540   :  { %1217 = vsyncadd [#allocation5], 4294967280 }
 0x541   :  { %904 = sfence }
 0x542   :  { %905 = vsyncpa [#allocation3], 1 }
 0x543   :  { %906 = vsyncpa [#allocation7], 1 }
 0x544   :  { %907 = vsyncpa [#allocation10], 1 }
 0x545   :  { %908 = vsyncpa [#allocation4], 1 }
 0x546   :  { %909 = vsyncpa [#allocation5], 1 }

</bundles_post_ra>
